<compile_context>
chip_gen: v7x
topology: tpu7x:2x2x1
jax: 0.10.0
libtpu: 0.0.40
codegen_flags: <defaults>
</compile_context>

<pallas_src>
import jax
import jax.numpy as jnp
from jax.experimental import pallas as pl
from jax.experimental.pallas import tpu as pltpu

_LANES = 128
_INV6 = 1.0 / 6.0


def _round_up(a, b):
    return ((a + b - 1) // b) * b


def _h_sigmoid_kernel(x_ref, o_ref):
    # x_ref / o_ref: (tile_rows, 128) in VMEM.  Pure VPU work.
    x = x_ref[...]
    y = jnp.minimum(jnp.maximum(x + 3.0, 0.0), 6.0) * _INV6
    o_ref[...] = y.astype(o_ref.dtype)


def _h_sigmoid_2d(x2, pack, itemsize):
    """Run the kernel on a lane-dense (rows, 128) matrix."""
    rows = x2.shape[0]

    # --- Generation-aware VMEM sizing --------------------------------------
    # 4 live buffers (double-buffered input + output).  Target ~1/2 of
    # physical VMEM for the buffers (64 MiB on v5e/v6e -> 16 MiB blocks,
    # 32 MiB on v7x -> 8 MiB blocks) and raise the scoped limit to match.
    try:
        vmem_capacity = int(pltpu.get_tpu_info().vmem_capacity_bytes)
    except Exception:  # pragma: no cover - conservative fallback
        vmem_capacity = 64 * 1024 * 1024
    buffer_budget = vmem_capacity // 2
    vmem_limit = min(vmem_capacity, buffer_budget + buffer_budget // 2)

    max_tile_rows = max(pack,
                        (buffer_budget // (4 * _LANES * itemsize)) // pack * pack)

    # --- Tile sizing: >= 4 grid steps when possible, >= ~512 KiB blocks ----
    floor_rows = max(pack, _round_up((512 * 1024) // (_LANES * itemsize), pack))
    target_rows = _round_up(pl.cdiv(rows, 4), pack)      # aim for >= 4 steps
    tile_rows = min(max_tile_rows, max(floor_rows, target_rows))
    tile_rows = min(tile_rows, _round_up(rows, pack))     # don't exceed rows
    if rows <= pack:
        tile_rows = rows                                   # full-array block
    tile_rows = max(tile_rows, 1)

    grid = (pl.cdiv(rows, tile_rows),)

    # TODO(synk): on v7x, pltpu.CORE_PARALLEL on this axis would shard blocks
    # across both TensorCores; kept "parallel" for portability.
    return pl.pallas_call(
        _h_sigmoid_kernel,
        out_shape=jax.ShapeDtypeStruct((rows, _LANES), x2.dtype),
        grid_spec=pltpu.PrefetchScalarGridSpec(
            num_scalar_prefetch=0,
            grid=grid,
            in_specs=[pl.BlockSpec((tile_rows, _LANES), lambda i: (i, 0))],
            out_specs=pl.BlockSpec((tile_rows, _LANES), lambda i: (i, 0)),
        ),
        compiler_params=pltpu.CompilerParams(
            dimension_semantics=("parallel",),
            vmem_limit_bytes=vmem_limit,
        ),
    )(x2)


def h_sigmoid(x):
    """h_sigmoid forward: relu6(x + 3) / 6, elementwise, any shape."""
    orig_shape = x.shape
    if not jnp.issubdtype(x.dtype, jnp.floating):
        x = x.astype(jnp.float32)   # integer arithmetic would be wrong
    dtype = x.dtype
    itemsize = jnp.dtype(dtype).itemsize
    pack = {4: 8, 2: 16, 1: 32}.get(itemsize, 8)   # native sublane packing

    flat = x.reshape(-1)
    total = flat.size
    main_total = (total // _LANES) * _LANES
    tail = total - main_total

    if tail == 0:
        # Common case: no pad, no slice — 1 HBM read + 1 HBM write total.
        out2 = _h_sigmoid_2d(flat.reshape(main_total // _LANES, _LANES),
                             pack, itemsize)
        return out2.reshape(orig_shape)

    # Ragged tail (< 128 elems): kernel on the lane-aligned bulk, tiny jnp
    # epilogue for the tail — avoids a full-tensor pad + slice round trip.
    pieces = []
    if main_total:
        out2 = _h_sigmoid_2d(flat[:main_total].reshape(main_total // _LANES,
                                                       _LANES),
                             pack, itemsize)
        pieces.append(out2.reshape(-1))
    tail_x = flat[main_total:]
    pieces.append((jnp.minimum(jnp.maximum(tail_x + 3.0, 0.0), 6.0)
                   * _INV6).astype(dtype))
    return jnp.concatenate(pieces).reshape(orig_shape)


if __name__ == "__main__":
    key = jax.random.PRNGKey(0)
    b, c, h, w = 2, 4, 16, 16
    # Spread values so the clamps at 0 and 6 are actually exercised.
    x = 8.0 * jax.random.normal(key, (b, c, h, w), dtype=jnp.float32)

    out = h_sigmoid(x)
    jax.block_until_ready(out)

    # Reference: relu6(x + 3) / 6
    ref = jnp.clip(x + 3.0, 0.0, 6.0) / 6.0
    assert out.shape == x.shape
    assert out.dtype == x.dtype
    assert jnp.allclose(out, ref, atol=1e-6, rtol=1e-6)

    # Also exercise a ragged-tail shape (total % 128 != 0) for coverage.
    x2 = 8.0 * jax.random.normal(key, (3, 5, 7), dtype=jnp.float32)
    out2 = h_sigmoid(x2)
    jax.block_until_ready(out2)
    ref2 = jnp.clip(x2 + 3.0, 0.0, 6.0) / 6.0
    assert jnp.allclose(out2, ref2, atol=1e-6, rtol=1e-6)

    print("KERNEL_OK")
</pallas_src>

<mosaic_0001>
module attributes {stable_mosaic.version = 11 : i64} {
  func.func @_h_sigmoid_kernel(%arg0: i32, %arg1: memref<16x128xf32, #tpu.memory_space<vmem>>, %arg2: memref<16x128xf32, #tpu.memory_space<vmem>>) attributes {dimension_semantics = [#tpu.dimension_semantics<parallel>], iteration_bounds = array<i64: 1>, scalar_prefetch = 0 : i64, scratch_operands = 0 : i64, tpu.core_type = #tpu.core_type<tc>, window_params = [{transform_indices = @transform_0, window_bounds = array<i64: 16, 128>}, {transform_indices = @transform_1, window_bounds = array<i64: 16, 128>}]} {
    %c0 = arith.constant 0 : index
    %c0_0 = arith.constant 0 : index
    %0 = vector.load %arg1[%c0, %c0_0] : memref<16x128xf32, #tpu.memory_space<vmem>>, vector<16x128xf32>
    %cst = arith.constant 3.000000e+00 : f32
    %1 = vector.broadcast %cst : f32 to vector<16x128xf32>
    %2 = arith.addf %0, %1 : vector<16x128xf32>
    %cst_1 = arith.constant 0.000000e+00 : f32
    %3 = vector.broadcast %cst_1 : f32 to vector<16x128xf32>
    %4 = arith.maximumf %2, %3 : vector<16x128xf32>
    %cst_2 = arith.constant 6.000000e+00 : f32
    %5 = vector.broadcast %cst_2 : f32 to vector<16x128xf32>
    %6 = arith.minimumf %4, %5 : vector<16x128xf32>
    %cst_3 = arith.constant 0.166666672 : f32
    %7 = vector.broadcast %cst_3 : f32 to vector<16x128xf32>
    %8 = arith.mulf %6, %7 : vector<16x128xf32>
    %c0_4 = arith.constant 0 : index
    %c0_5 = arith.constant 0 : index
    %9 = vector.load %arg2[%c0_4, %c0_5] : memref<16x128xf32, #tpu.memory_space<vmem>>, vector<16x128xf32>
    tpu.vector_store %arg2[%c0_4, %c0_5], %8 {strides = array<i32>} : memref<16x128xf32, #tpu.memory_space<vmem>>, vector<16x128xf32>,
    return
  }
  func.func @transform_0(%arg0: i32) -> (i32, i32) {
    %c0_i32 = arith.constant 0 : i32
    %c0_i32_0 = arith.constant 0 : i32
    return %arg0, %c0_i32 : i32, i32
  }
  func.func @transform_1(%arg0: i32) -> (i32, i32) {
    %c0_i32 = arith.constant 0 : i32
    %c0_i32_0 = arith.constant 0 : i32
    return %arg0, %c0_i32 : i32, i32
  }
}

</mosaic_0001>

<bundles_post_ra>
// kernel: tpu_custom_call.1
= control target key start
LH: loop header
LB: loop body
LE: loop exit
PB: predicated region body
PF: predicated region fallthrough
CT: control target
= control target key end

     0   :  { %6 = vsyncpa [#allocation3], 0  ;;  %s148_s0 = inlined_call_operand.hbm [shape: f32[16,128], index: 0, kind: input, shape index: {}]   ;;  %s149_s1 = inlined_call_operand.hbm [shape: f32[16,128], index: 1, kind: output, shape index: {}]  }
   0x1   :  { %7 = vsyncpa [#allocation4], 0  ;;  %s104_s6 = smov [#allocation2]   ;;  %s56_s10 = scalar_lea.hbm %s148_s0, 256 }
   0x2   :  { %s13_s7 = sshll.u32 %s104_s6, 4  ;;  %p57_p0 = scmp.ne.s32.totalorder %s148_s0, %s56_s10  ;;  %s14_s7 = int_to_ptr.vmem [resolvable:$true] %s13_s7 }
   0x3   :  { %p60_p1 = scmp.lt.u32.totalorder %s56_s10, %s148_s0 }
   0x5   :  { %p62_p2 = pnand %p60_p1, %p57_p0 }
   0x7   :  { %65 = shalt.err (!%p62_p2)
}
   0x8   :  { %s66_s15 = scalar_lea.vmem %s14_s7, 256  ;;  %p71_p4 = scmp.lt.s32.totalorder %s14_s7, %s14_s7 }
   0x9   :  { %p67_p3 = scmp.ne.s32.totalorder %s14_s7, %s66_s15  ;;  %p72_p5 = scmp.lt.s32.totalorder %s66_s15, %s66_s15 }
   0xb   :  { %p73_p6 = por %p72_p5, %p71_p4 }
   0xd   :  { %p74_p7 = pnand %p73_p6, %p67_p3 }
   0xf   :  { %77 = shalt.err (!%p74_p7)
}
  0x10   :  { %s105_s16 = smov 128   ;;  %s106_s17 = smov 8  }
  0x11   :  { %19 = dma.hbm_to_vmem [thread:$0]  %s148_s0, 256, %s14_s7, [#allocation3], %s105_s16, %s105_s16, %s106_s17  }
  0x12   :  { %100 = dma.done.wait [#allocation3], 256  }
  0x13   :  { %101 = vsyncadd [#allocation3], 4294967040  ;;  %v23_v0 = vld [vmem:[#allocation2] sm:$0xff]  ;;  %v24_v1 = vld [vmem:[#allocation2 + $0x8] sm:$0xff]  ;;  %s107_s20 = smov [#allocation5]  }
  0x14   :  { %v25_v2 = vadd.f32 3.0, %v23_v0  ;;  %v26_v3 = vadd.f32 3.0, %v24_v1  ;;  %s40_s21 = sshll.u32 %s107_s20, 4  ;;  %s41_s21 = int_to_ptr.vmem [resolvable:$true] %s40_s21 }
  0x15   :  { %s78_s22 = scalar_lea.vmem %s41_s21, 256  ;;  %p83_p9 = scmp.lt.s32.totalorder %s41_s21, %s41_s21 }
  0x16   :  { %v27_v4 = vmax.f32 %v25_v2, 0.0  ;;  %v28_v5 = vmax.f32 %v26_v3, 0.0  ;;  %p79_p8 = scmp.ne.s32.totalorder %s41_s21, %s78_s22  ;;  %p84_p10 = scmp.lt.s32.totalorder %s78_s22, %s78_s22 }
  0x18   :  { %v29_v6 = vmin.f32 %v27_v4, 6.0  ;;  %v30_v7 = vmin.f32 %v28_v5, 6.0  ;;  %p85_p11 = por %p84_p10, %p83_p9 }
  0x1a   :  { %v31_v8 = vmul.f32 0.16666667, %v29_v6  ;;  %v32_v9 = vmul.f32 0.16666667, %v30_v7  ;;  %p86_p12 = pnand %p85_p11, %p79_p8 }
  0x1c   :  { %33 = vst [vmem:[#allocation5] sm:$0xff] %v31_v8  ;;  %34 = vst [vmem:[#allocation5 + $0x8] sm:$0xff] %v32_v9 }
  0x1d   :  { %89 = shalt.err (!%p86_p12)
}
  0x1e   :  { %s90_s24 = scalar_lea.hbm %s149_s1, 256 }
  0x1f   :  { %p91_p13 = scmp.ne.s32.totalorder %s149_s1, %s90_s24  ;;  %p94_p0 = scmp.lt.u32.totalorder %s90_s24, %s149_s1 }
  0x21   :  { %p96_p1 = pnand %p94_p0, %p91_p13 }
  0x23   :  { %99 = shalt.err (!%p96_p1)
}
  0x24   :  { %46 = dma.vmem_to_hbm [thread:$0]  %s41_s21, 256, %s149_s1, [#allocation4], %s105_s16, %s105_s16, %s106_s17  }
  0x25   :  { %102 = dma.done.wait [#allocation4], 256  }
  0x26   :  { %103 = vsyncadd [#allocation4], 4294967040 }
  0x27   :  { %50 = vsyncpa [#allocation3], 1 }
  0x28   :  { %51 = vsyncpa [#allocation4], 1 }

</bundles_post_ra>
